<compile_context>
chip_gen: v7x
topology: tpu7x:2x2x1
jax: 0.10.0
libtpu: 0.0.40
codegen_flags: <defaults>
</compile_context>

<pallas_src>
import jax
import jax.numpy as jnp
from jax.experimental import pallas as pl
from jax.experimental.pallas import tpu as pltpu


# ----------------------------------------------------------------------------- kernels

def _linear_relu_kernel(x_ref, w_ref, b_ref, o_ref):
    """Single-K-tile path: whole contraction in one grid step.

    x_ref: (tm, K)   compute dtype
    w_ref: (K, tn)   compute dtype, already transposed to (in, out)
    b_ref: (1, tn)   f32
    o_ref: (tm, tn)  output dtype
    """
    y = jnp.dot(x_ref[...], w_ref[...], preferred_element_type=jnp.float32)
    o_ref[...] = jnp.maximum(y + b_ref[...], 0.0).astype(o_ref.dtype)


def _linear_relu_kernel_ksplit_f32out(x_ref, w_ref, b_ref, o_ref):
    """K-split path, f32 output: accumulate directly into the resident output block."""
    k = pl.program_id(2)
    part = jnp.dot(x_ref[...], w_ref[...], preferred_element_type=jnp.float32)

    @pl.when(k == 0)
    def _():
        o_ref[...] = part

    @pl.when(k > 0)
    def _():
        o_ref[...] += part

    @pl.when(k == pl.num_programs(2) - 1)
    def _():
        o_ref[...] = jnp.maximum(o_ref[...] + b_ref[...], 0.0)


def _linear_relu_kernel_ksplit_acc(x_ref, w_ref, b_ref, o_ref, acc_ref):
    """K-split path, narrow (e.g. bf16) output: f32 VMEM accumulator scratch."""
    k = pl.program_id(2)

    @pl.when(k == 0)
    def _():
        acc_ref[...] = jnp.zeros_like(acc_ref)

    acc_ref[...] += jnp.dot(x_ref[...], w_ref[...], preferred_element_type=jnp.float32)

    @pl.when(k == pl.num_programs(2) - 1)
    def _():
        o_ref[...] = jnp.maximum(acc_ref[...] + b_ref[...], 0.0).astype(o_ref.dtype)


# ----------------------------------------------------------------------------- tiling

def _chip_defaults():
    """Per-generation tile defaults + physical VMEM capacity (with safe fallbacks)."""
    try:
        kind = jax.devices()[0].device_kind.lower()
    except Exception:
        kind = ""
    vmem_cap = None
    try:
        vmem_cap = int(pltpu.get_tpu_info().vmem_capacity_bytes)
    except Exception:
        pass

    if "v7" in kind or "7x" in kind:
        tm, tn, tk = 768, 768, 1024            # 64 MiB VMEM per TC; ~310 FLOP/B needed
        cap_guess = 64 << 20
    elif "v6" in kind or "trillium" in kind:
        tm, tn, tk = 1024, 1024, 1024          # 128 MiB VMEM; ~340 FLOP/B needed
        cap_guess = 128 << 20
    elif "v5" in kind:
        tm, tn, tk = 512, 512, 1024            # ~120 FLOP/B needed; 4x128^2 MXU
        cap_guess = 128 << 20
    else:
        tm, tn, tk = 512, 512, 1024            # conservative default
        cap_guess = 64 << 20

    if vmem_cap is None:
        vmem_cap = cap_guess
    return tm, tn, tk, vmem_cap


def _fit_tile(dim, want, align):
    """Largest tile <= want that divides dim and is a multiple of align
    (or the full dim, which is always a legal block extent)."""
    if dim <= want:
        return dim
    t = max(align, (want // align) * align)
    while t >= align:
        if dim % t == 0:
            return t
        t -= align
    return dim   # no aligned divisor found: fall back to a single full-extent block


# ----------------------------------------------------------------------------- wrapper

def prepare_linear_block_params(weight, bias, compute_dtype=jnp.bfloat16):
    """One-time (cacheable) parameter prep, OUTSIDE the hot path.

    weight: (out_features, in_features)  -- PyTorch nn.Linear layout
    bias:   (out_features,)
    Returns (weight_t, bias2):
      weight_t: (in_features, out_features) in compute_dtype (K on the sublane axis)
      bias2:    (1, out_features) f32
    """
    w_t = jnp.asarray(weight).T
    if compute_dtype is not None and jnp.dtype(compute_dtype) != w_t.dtype:
        w_t = w_t.astype(compute_dtype)
    b2 = jnp.asarray(bias).reshape(1, -1).astype(jnp.float32)
    return w_t, b2


def linear_block(x, weight_t, bias2, *, tm=None, tn=None, tk=None, out_dtype=None):
    """y = relu(x @ weight.T + bias), matching torch.nn.Linear + ReLU.

    x:        (N, in_features)                 compute dtype (bf16 or f32)
    weight_t: (in_features, out_features)      pre-transposed / pre-cast (see prepare_*)
    bias2:    (1, out_features) f32
    """
    n, in_f = x.shape
    in_f_w, out_f = weight_t.shape
    assert in_f == in_f_w, "weight_t must be (in_features, out_features)"
    assert bias2.shape == (1, out_f)
    if out_dtype is None:
        out_dtype = x.dtype

    dtm, dtn, dtk, vmem_cap = _chip_defaults()
    tm = tm if tm is not None else dtm
    tn = tn if tn is not None else dtn
    tk = tk if tk is not None else dtk
    tm = _fit_tile(n, tm, 8)          # sublane axis of x / out
    tn = _fit_tile(out_f, tn, 128)    # lane axis of w_t / out
    tk = _fit_tile(in_f, tk, 128)     # lane axis of x, sublane axis of w_t
    # TODO(synk): support non-divisible N / out_f / in_f via padded tail tiles.
    assert n % tm == 0 and out_f % tn == 0 and in_f % tk == 0, \
        "tile sizes must divide the problem dims"

    nk = in_f // tk
    xb = jnp.dtype(x.dtype).itemsize
    wb = jnp.dtype(weight_t.dtype).itemsize
    ob = jnp.dtype(out_dtype).itemsize

    if nk == 1:
        # Common case: whole reduction fits one tile -> 2-D fully parallel grid,
        # no accumulator, no init/finalize branches.
        grid = (n // tm, out_f // tn)
        kernel = _linear_relu_kernel
        in_specs = [
            pl.BlockSpec((tm, in_f), lambda i, j: (i, 0)),     # x tile (resident over j)
            pl.BlockSpec((in_f, tn), lambda i, j: (0, j)),     # weight tile
            pl.BlockSpec((1, tn), lambda i, j: (0, j)),        # bias tile (f32)
        ]
        out_specs = pl.BlockSpec((tm, tn), lambda i, j: (i, j))
        scratch_shapes = []
        dim_sem = ("parallel", "parallel")
        acc_bytes = 0
        tile_k = in_f
    else:
        grid = (n // tm, out_f // tn, nk)
        if jnp.dtype(out_dtype) == jnp.float32:
            kernel = _linear_relu_kernel_ksplit_f32out
            scratch_shapes = []
            acc_bytes = 0
        else:
            kernel = _linear_relu_kernel_ksplit_acc
            scratch_shapes = [pltpu.VMEM((tm, tn), jnp.float32)]
            acc_bytes = tm * tn * 4
        in_specs = [
            pl.BlockSpec((tm, tk), lambda i, j, k: (i, k)),
            pl.BlockSpec((tk, tn), lambda i, j, k: (k, j)),
            pl.BlockSpec((1, tn), lambda i, j, k: (0, j)),
        ]
        out_specs = pl.BlockSpec((tm, tn), lambda i, j, k: (i, j))
        dim_sem = ("parallel", "parallel", "arbitrary")
        tile_k = tk

    # VMEM budget: double-buffered x/w/bias tiles + out tile + (optional) f32 acc,
    # with headroom for Mosaic internal scratch, capped at ~75% of physical VMEM
    # (never request the full 64 MiB on v7x).
    est = 2 * (tm * tile_k * xb + tile_k * tn * wb + tn * 4) + 2 * tm * tn * ob + acc_bytes
    vmem_limit = int(min(max(int(1.5 * est), 16 << 20), int(0.75 * vmem_cap)))

    # Actual tiled HBM traffic under this grid (x re-read per output-column block,
    # weight re-read per row block), advisory only.
    cost = pl.CostEstimate(
        flops=2 * n * in_f * out_f,
        transcendentals=0,
        bytes_accessed=(n * in_f * xb * (out_f // tn)
                        + in_f * out_f * wb * (n // tm)
                        + out_f * 4 * (n // tm)
                        + n * out_f * ob),
    )

    return pl.pallas_call(
        kernel,
        out_shape=jax.ShapeDtypeStruct((n, out_f), out_dtype),
        grid_spec=pltpu.PrefetchScalarGridSpec(
            num_scalar_prefetch=0,
            grid=grid,
            in_specs=in_specs,
            out_specs=out_specs,
            scratch_shapes=scratch_shapes,
        ),
        compiler_params=pltpu.CompilerParams(
            dimension_semantics=dim_sem,
            vmem_limit_bytes=vmem_limit,
        ),
        cost_estimate=cost,
    )(x, weight_t, bias2)


# ----------------------------------------------------------------------------- init

def init_linear_block_params(key, in_features, out_features):
    """Matches LinearBlock.init_weights():
    - weight: kaiming_normal_(a=0, nonlinearity='relu', mode='fan_in')
              => std = sqrt(2 / fan_in), fan_in = in_features
    - bias:   nn.Linear default: U(-1/sqrt(fan_in), 1/sqrt(fan_in))
    """
    kw, kb = jax.random.split(key)
    std = (2.0 / in_features) ** 0.5
    weight = std * jax.random.normal(kw, (out_features, in_features), jnp.float32)
    bound = 1.0 / (in_features ** 0.5)
    bias = jax.random.uniform(kb, (out_features,), jnp.float32, -bound, bound)
    return weight, bias


# ----------------------------------------------------------------------------- demo

if __name__ == "__main__":
    key = jax.random.PRNGKey(0)
    k_x, k_p, k_x2, k_p2 = jax.random.split(key, 4)

    # ---- main demo shapes (small INR-style layer): 256 points, 64 -> 128 features.
    N, IN_F, OUT_F = 256, 64, 128
    x = jax.random.normal(k_x, (N, IN_F), jnp.float32)
    weight, bias = init_linear_block_params(k_p, IN_F, OUT_F)
    y_ref = jnp.maximum(x @ weight.T + bias, 0.0)

    # 1) f32 path (single-K, 2-D grid): exact semantics check vs plain-JAX reference.
    w_t32, b2 = prepare_linear_block_params(weight, bias, compute_dtype=jnp.float32)
    y_f32 = jax.block_until_ready(linear_block(x, w_t32, b2))
    assert y_f32.shape == (N, OUT_F) and y_f32.dtype == jnp.float32
    assert jnp.allclose(y_f32, y_ref, atol=1e-5, rtol=1e-5)

    # 2) bf16 operand path (fast): params prepared once (cacheable), activations arrive
    #    in bf16 from the producer -> no per-call casts on the hot path.
    w_tbf, _ = prepare_linear_block_params(weight, bias, compute_dtype=jnp.bfloat16)
    x_bf = x.astype(jnp.bfloat16)                       # "producer" emits bf16 once
    y_bf = jax.block_until_ready(linear_block(x_bf, w_tbf, b2))
    assert y_bf.shape == (N, OUT_F) and y_bf.dtype == jnp.bfloat16
    x_q = x_bf.astype(jnp.float32)
    w_q = weight.astype(jnp.bfloat16).astype(jnp.float32)
    y_ref_q = jnp.maximum(x_q @ w_q.T + bias, 0.0)
    assert jnp.allclose(y_bf.astype(jnp.float32), y_ref_q, atol=1e-2, rtol=1e-2)
    assert jnp.allclose(y_bf.astype(jnp.float32), y_ref, atol=6e-2, rtol=6e-2)

    # 3) K-split fallback paths (forced small tk) — exercises the 3-D grid kernels.
    N2, IN2, OUT2 = 128, 256, 256
    x2 = jax.random.normal(k_x2, (N2, IN2), jnp.float32)
    w2, bvec2 = init_linear_block_params(k_p2, IN2, OUT2)
    y2_ref = jnp.maximum(x2 @ w2.T + bvec2, 0.0)
    w2_t32, b2_2 = prepare_linear_block_params(w2, bvec2, compute_dtype=jnp.float32)
    # f32 output -> accumulate directly into the resident output block (no scratch).
    y2_f32 = jax.block_until_ready(linear_block(x2, w2_t32, b2_2, tk=128))
    assert jnp.allclose(y2_f32, y2_ref, atol=1e-5, rtol=1e-5)
    # bf16 in / bf16 out -> f32 VMEM accumulator scratch path.
    w2_tbf, _ = prepare_linear_block_params(w2, bvec2, compute_dtype=jnp.bfloat16)
    y2_bf = jax.block_until_ready(linear_block(x2.astype(jnp.bfloat16), w2_tbf, b2_2,
                                               tk=128))
    x2_q = x2.astype(jnp.bfloat16).astype(jnp.float32)
    w2_q = w2.astype(jnp.bfloat16).astype(jnp.float32)
    y2_ref_q = jnp.maximum(x2_q @ w2_q.T + bvec2, 0.0)
    assert jnp.allclose(y2_bf.astype(jnp.float32), y2_ref_q, atol=2e-2, rtol=2e-2)

    print("KERNEL_OK")
</pallas_src>

<mosaic_0001>
module attributes {stable_mosaic.version = 11 : i64} {
  func.func @_linear_relu_kernel(%arg0: i32, %arg1: i32, %arg2: memref<256x64xf32, #tpu.memory_space<vmem>>, %arg3: memref<64x128xf32, #tpu.memory_space<vmem>>, %arg4: memref<1x128xf32, #tpu.memory_space<vmem>>, %arg5: memref<256x128xf32, #tpu.memory_space<vmem>>) attributes {dimension_semantics = [#tpu.dimension_semantics<parallel>, #tpu.dimension_semantics<parallel>], iteration_bounds = array<i64: 1, 1>, scalar_prefetch = 0 : i64, scratch_operands = 0 : i64, tpu.core_type = #tpu.core_type<tc>, window_params = [{transform_indices = @transform_0, window_bounds = array<i64: 256, 64>}, {transform_indices = @transform_1, window_bounds = array<i64: 64, 128>}, {transform_indices = @transform_2, window_bounds = array<i64: 1, 128>}, {transform_indices = @transform_3, window_bounds = array<i64: 256, 128>}]} {
    %c0 = arith.constant 0 : index
    %c0_0 = arith.constant 0 : index
    %0 = vector.load %arg2[%c0, %c0_0] : memref<256x64xf32, #tpu.memory_space<vmem>>, vector<256x64xf32>
    %c0_1 = arith.constant 0 : index
    %c0_2 = arith.constant 0 : index
    %1 = vector.load %arg3[%c0_1, %c0_2] : memref<64x128xf32, #tpu.memory_space<vmem>>, vector<64x128xf32>
    %cst = arith.constant dense<0.000000e+00> : vector<256x128xf32>
    %2 = tpu.matmul %0, %1, %cst {dimension_numbers = #tpu.dot_dimension_numbers<[1], [0], [0], [1], [0, 0, 1, 1], [], []>} : vector<256x64xf32>, vector<64x128xf32>, vector<256x128xf32> -> vector<256x128xf32>
    %c0_3 = arith.constant 0 : index
    %c0_4 = arith.constant 0 : index
    %3 = vector.load %arg4[%c0_3, %c0_4] : memref<1x128xf32, #tpu.memory_space<vmem>>, vector<1x128xf32>
    %4 = vector.broadcast %3 : vector<1x128xf32> to vector<256x128xf32>
    %5 = arith.addf %2, %4 : vector<256x128xf32>
    %cst_5 = arith.constant 0.000000e+00 : f32
    %6 = vector.broadcast %cst_5 : f32 to vector<256x128xf32>
    %7 = arith.maximumf %5, %6 : vector<256x128xf32>
    %c0_6 = arith.constant 0 : index
    %c0_7 = arith.constant 0 : index
    %8 = vector.load %arg5[%c0_6, %c0_7] : memref<256x128xf32, #tpu.memory_space<vmem>>, vector<256x128xf32>
    tpu.vector_store %arg5[%c0_6, %c0_7], %7 {strides = array<i32>} : memref<256x128xf32, #tpu.memory_space<vmem>>, vector<256x128xf32>,
    return
  }
  func.func @transform_0(%arg0: i32, %arg1: i32) -> (i32, i32) {
    %c0_i32 = arith.constant 0 : i32
    %c0_i32_0 = arith.constant 0 : i32
    return %arg0, %c0_i32 : i32, i32
  }
  func.func @transform_1(%arg0: i32, %arg1: i32) -> (i32, i32) {
    %c0_i32 = arith.constant 0 : i32
    %c0_i32_0 = arith.constant 0 : i32
    return %c0_i32, %arg1 : i32, i32
  }
  func.func @transform_2(%arg0: i32, %arg1: i32) -> (i32, i32) {
    %c0_i32 = arith.constant 0 : i32
    %c0_i32_0 = arith.constant 0 : i32
    return %c0_i32, %arg1 : i32, i32
  }
  func.func @transform_3(%arg0: i32, %arg1: i32) -> (i32, i32) {
    %c0_i32 = arith.constant 0 : i32
    return %arg0, %arg1 : i32, i32
  }
}

</mosaic_0001>

<bundles_post_ra>
// kernel: tpu_custom_call.1
= control target key start
LH: loop header
LB: loop body
LE: loop exit
PB: predicated region body
PF: predicated region fallthrough
CT: control target
= control target key end

     0   :  { %vm62_vm0 = vcmask 523264   ;;  %s876_s0 = inlined_call_operand.vmem [shape: f32[256,64], index: 0, kind: input, shape index: {}]   ;;  %s877_s1 = inlined_call_operand.vmem [shape: f32[64,128], index: 1, kind: input, shape index: {}]   ;;  %s878_s2 = inlined_call_operand.vmem [shape: f32[1,128], index: 2, kind: input, shape index: {}]   ;;  %s879_s3 = inlined_call_operand.hbm [shape: f32[256,128], index: 3, kind: output, shape index: {}]  }
   0x1   :  { %v47_v0 = vld [vmem:[%s877_s1] sm:$0xff]  ;;  %v48_v1 = vld [vmem:[%s877_s1 + $0x8] sm:$0xff]  ;;  %v49_v2 = vld [vmem:[%s877_s1 + $0x10] sm:$0xff] }
   0x2   :  { %v601_v3 = vpack.c.bf16 %v48_v1, %v47_v0  ;;  %v50_v4 = vld [vmem:[%s877_s1 + $0x18] sm:$0xff]  ;;  %v51_v6 = vld [vmem:[%s877_s1 + $0x20] sm:$0xff]  ;;  %v52_v7 = vld [vmem:[%s877_s1 + $0x28] sm:$0xff] }
   0x3   :  { %v605_v5 = vpack.c.bf16 %v50_v4, %v49_v2  ;;  %v15_v8 = vld [vmem:[%s876_s0] sm:$0xff]  ;;  %v609_v10 = vpack.c.bf16 %v52_v7, %v51_v6  ;;  %v53_v11 = vld [vmem:[%s877_s1 + $0x30] sm:$0xff]  ;;  %v54_v12 = vld [vmem:[%s877_s1 + $0x38] sm:$0xff] }
   0x4   :  { %602 = vmatprep.subr.bf16.mxu0 %v601_v3  ;;  %617 = vmatprep.subr.bf16.mxu1 %v601_v3  ;;  %v31_v9 = vld [vmem:[%s876_s0 + $0x80] sm:$0xff]  ;;  %v613_v13 = vpack.c.bf16 %v54_v12, %v53_v11 }
   0x5   :  { %604 = vmatpush3.bf16.msra.mxu0 %v601_v3  ;;  %621 = vmatpush3.bf16.msra.mxu1 %v601_v3 }
   0x6   :  { %606 = vmatprep.subr.bf16.mxu0 %v605_v5  ;;  %618 = vmatprep.subr.bf16.mxu1 %v605_v5 }
   0x7   :  { %553 = vmatprep.mubr.msk.f32.mxu0 %vm62_vm0, %v15_v8  ;;  %577 = vmatprep.mubr.msk.f32.mxu1 %vm62_vm0, %v31_v9 }
   0x9   :  { %608 = vmatpush3.bf16.msra.mxu0 %v605_v5  ;;  %622 = vmatpush3.bf16.msra.mxu1 %v605_v5 }
   0xa   :  { %610 = vmatprep.subr.bf16.mxu0 %v609_v10  ;;  %619 = vmatprep.subr.bf16.mxu1 %v609_v10 }
   0xd   :  { %612 = vmatpush3.bf16.msra.mxu0 %v609_v10  ;;  %623 = vmatpush3.bf16.msra.mxu1 %v609_v10 }
   0xe   :  { %614 = vmatprep.subr.bf16.mxu0 %v613_v13  ;;  %620 = vmatprep.subr.bf16.mxu1 %v613_v13 }
   0xf   :  { %8 = vsyncpa [#allocation3], 0  ;;  %v16_v14 = vld [vmem:[%s876_s0 + $0x8] sm:$0xff]  ;;  %v17_v16 = vld [vmem:[%s876_s0 + $0x10] sm:$0xff] }
  0x10   :  { %v32_v15 = vld [vmem:[%s876_s0 + $0x88] sm:$0xff]  ;;  %v33_v17 = vld [vmem:[%s876_s0 + $0x90] sm:$0xff]  ;;  %v18_v18 = vld [vmem:[%s876_s0 + $0x18] sm:$0xff] }
  0x11   :  { %616 = vmatpush3.bf16.msra.mxu0 %v613_v13  ;;  %624 = vmatpush3.bf16.msra.mxu1 %v613_v13  ;;  %v34_v19 = vld [vmem:[%s876_s0 + $0x98] sm:$0xff]  ;;  %v19_v20 = vld [vmem:[%s876_s0 + $0x20] sm:$0xff]  ;;  %v20_v22 = vld [vmem:[%s876_s0 + $0x28] sm:$0xff] }
  0x12   :  { %v35_v21 = vld [vmem:[%s876_s0 + $0xa0] sm:$0xff]  ;;  %v36_v23 = vld [vmem:[%s876_s0 + $0xa8] sm:$0xff]  ;;  %v21_v24 = vld [vmem:[%s876_s0 + $0x30] sm:$0xff] }
  0x13   :  { %v37_v25 = vld [vmem:[%s876_s0 + $0xb0] sm:$0xff]  ;;  %v22_v26 = vld [vmem:[%s876_s0 + $0x38] sm:$0xff]  ;;  %v23_v28 = vld [vmem:[%s876_s0 + $0x40] sm:$0xff] }
  0x14   :  { %554 = vmatmul.mubr.msk.f32.vlgmr.msra.gmra.mrb[0].mxu0 %vm62_vm0, %v16_v14  ;;  %578 = vmatmul.mubr.msk.f32.vlgmr.msra.gmra.mrb[0].mxu1 %vm62_vm0, %v32_v15  ;;  %v38_v27 = vld [vmem:[%s876_s0 + $0xb8] sm:$0xff]  ;;  %v39_v29 = vld [vmem:[%s876_s0 + $0xc0] sm:$0xff]  ;;  %v24_v30 = vld [vmem:[%s876_s0 + $0x48] sm:$0xff] }
  0x15   :  { %556 = vmatprep.mubr.msk.f32.mxu0 %vm62_vm0, %v17_v16  ;;  %580 = vmatprep.mubr.msk.f32.mxu1 %vm62_vm0, %v33_v17  ;;  %v40_v31 = vld [vmem:[%s876_s0 + $0xc8] sm:$0xff]  ;;  %v25_v32 = vld [vmem:[%s876_s0 + $0x50] sm:$0xff]  ;;  %v26_v34 = vld [vmem:[%s876_s0 + $0x58] sm:$0xff] }
  0x16   :  { %v41_v33 = vld [vmem:[%s876_s0 + $0xd0] sm:$0xff]  ;;  %v42_v35 = vld [vmem:[%s876_s0 + $0xd8] sm:$0xff]  ;;  %v27_v36 = vld [vmem:[%s876_s0 + $0x60] sm:$0xff] }
  0x17   :  { %v43_v37 = vld [vmem:[%s876_s0 + $0xe0] sm:$0xff]  ;;  %v28_v38 = vld [vmem:[%s876_s0 + $0x68] sm:$0xff]  ;;  %v29_v40 = vld [vmem:[%s876_s0 + $0x70] sm:$0xff] }
  0x18   :  { %557 = vmatmul.mubr.msk.f32.gmra.mrb[2].mxu0 %vm62_vm0, %v18_v18  ;;  %581 = vmatmul.mubr.msk.f32.gmra.mrb[2].mxu1 %vm62_vm0, %v34_v19  ;;  %v44_v39 = vld [vmem:[%s876_s0 + $0xe8] sm:$0xff]  ;;  %v45_v41 = vld [vmem:[%s876_s0 + $0xf0] sm:$0xff]  ;;  %v30_v42 = vld [vmem:[%s876_s0 + $0x78] sm:$0xff] }
  0x19   :  { %559 = vmatprep.mubr.msk.f32.mxu0 %vm62_vm0, %v19_v20  ;;  %583 = vmatprep.mubr.msk.f32.mxu1 %vm62_vm0, %v35_v21  ;;  %v46_v43 = vld [vmem:[%s876_s0 + $0xf8] sm:$0xff]  ;;  %v830_v44 = vld [vmem:[%s878_s2] ss:$0 sm:$0xff]  ;;  %s652_s0 = smov [#allocation2]  }
  0x1a   :  { %s453_s2 = sshll.u32 %s652_s0, 4  ;;  %s454_s2 = int_to_ptr.vmem [resolvable:$true] %s453_s2 }
  0x1b   :  { %s628_s10 = scalar_lea.vmem %s454_s2, 4096  ;;  %p633_p1 = scmp.lt.s32.totalorder %s454_s2, %s454_s2 }
  0x1c   :  { %560 = vmatmul.mubr.msk.f32.gmra.mrb[4].mxu0 %vm62_vm0, %v20_v22  ;;  %584 = vmatmul.mubr.msk.f32.gmra.mrb[4].mxu1 %vm62_vm0, %v36_v23  ;;  %p629_p0 = scmp.ne.s32.totalorder %s454_s2, %s628_s10  ;;  %p634_p2 = scmp.lt.s32.totalorder %s628_s10, %s628_s10 }
  0x1d   :  { %562 = vmatprep.mubr.msk.f32.mxu0 %vm62_vm0, %v21_v24  ;;  %586 = vmatprep.mubr.msk.f32.mxu1 %vm62_vm0, %v37_v25 }
  0x1e   :  { %p635_p3 = por %p634_p2, %p633_p1 }
  0x20   :  { %563 = vmatmul.mubr.msk.f32.gmra.mrb[6].mxu0 %vm62_vm0, %v22_v26  ;;  %587 = vmatmul.mubr.msk.f32.gmra.mrb[6].mxu1 %vm62_vm0, %v38_v27  ;;  %p636_p4 = pnand %p635_p3, %p629_p0 }
  0x21   :  { %565 = vmatprep.mubr.msk.f32.mxu0 %vm62_vm0, %v23_v28  ;;  %589 = vmatprep.mubr.msk.f32.mxu1 %vm62_vm0, %v39_v29 }
  0x24   :  { %566 = vmatmul.mubr.msk.f32.gmra.mrb[8].mxu0 %vm62_vm0, %v24_v30  ;;  %590 = vmatmul.mubr.msk.f32.gmra.mrb[8].mxu1 %vm62_vm0, %v40_v31 }
  0x25   :  { %568 = vmatprep.mubr.msk.f32.mxu0 %vm62_vm0, %v25_v32  ;;  %592 = vmatprep.mubr.msk.f32.mxu1 %vm62_vm0, %v41_v33 }
  0x28   :  { %569 = vmatmul.mubr.msk.f32.gmra.mrb[10].mxu0 %vm62_vm0, %v26_v34  ;;  %593 = vmatmul.mubr.msk.f32.gmra.mrb[10].mxu1 %vm62_vm0, %v42_v35 }
  0x29   :  { %571 = vmatprep.mubr.msk.f32.mxu0 %vm62_vm0, %v27_v36  ;;  %595 = vmatprep.mubr.msk.f32.mxu1 %vm62_vm0, %v43_v37 }
  0x2c   :  { %572 = vmatmul.mubr.msk.f32.gmra.mrb[12].mxu0 %vm62_vm0, %v28_v38  ;;  %596 = vmatmul.mubr.msk.f32.gmra.mrb[12].mxu1 %vm62_vm0, %v44_v39 }
  0x2d   :  { %574 = vmatprep.mubr.msk.f32.mxu0 %vm62_vm0, %v29_v40  ;;  %598 = vmatprep.mubr.msk.f32.mxu1 %vm62_vm0, %v45_v41 }
  0x30   :  { %575 = vmatmul.mubr.msk.f32.gmra.mrb[14].mxu0 %vm62_vm0, %v30_v42  ;;  %599 = vmatmul.mubr.msk.f32.gmra.mrb[14].mxu1 %vm62_vm0, %v46_v43 }
  0xe7   :  { %v555_v45 = vpop.f32.mrb[0].mxu0  ;;  %v579_v46 = vpop.f32.mrb[0].mxu1 }
  0xe8   :  { %v231_v47 = vadd.f32 %v555_v45, %v830_v44  ;;  %v311_v48 = vadd.f32 %v579_v46, %v830_v44  ;;  %v225_v49 = vpop.f32.mrb[1].mxu0  ;;  %v305_v50 = vpop.f32.mrb[1].mxu1 }
  0xe9   :  { %v226_v51 = vadd.f32 %v830_v44, %v225_v49  ;;  %v306_v52 = vadd.f32 %v830_v44, %v305_v50 }
  0xea   :  { %v385_v53 = vmax.f32 %v231_v47, 0.0  ;;  %v401_v54 = vmax.f32 %v311_v48, 0.0 }
  0xeb   :  { %v384_v55 = vmax.f32 %v226_v51, 0.0  ;;  %v400_v56 = vmax.f32 %v306_v52, 0.0  ;;  %v558_v57 = vpop.f32.mrb[2].mxu0  ;;  %v582_v58 = vpop.f32.mrb[2].mxu1 }
  0xec   :  { %417 = vst [vmem:[#allocation2 + $0x8] sm:$0xff] %v385_v53  ;;  %433 = vst [vmem:[#allocation2 + $0x88] sm:$0xff] %v401_v54  ;;  %v241_v59 = vadd.f32 %v558_v57, %v830_v44  ;;  %v321_v60 = vadd.f32 %v582_v58, %v830_v44  ;;  %v235_v61 = vpop.f32.mrb[3].mxu0  ;;  %v315_v62 = vpop.f32.mrb[3].mxu1 }
  0xed   :  { %416 = vst [vmem:[#allocation2] sm:$0xff] %v384_v55  ;;  %432 = vst [vmem:[#allocation2 + $0x80] sm:$0xff] %v400_v56  ;;  %v236_v63 = vadd.f32 %v830_v44, %v235_v61  ;;  %v316_v0 = vadd.f32 %v830_v44, %v315_v62 }
  0xee   :  { %v387_v1 = vmax.f32 %v241_v59, 0.0  ;;  %v403_v2 = vmax.f32 %v321_v60, 0.0 }
  0xef   :  { %v386_v3 = vmax.f32 %v236_v63, 0.0  ;;  %v402_v4 = vmax.f32 %v316_v0, 0.0  ;;  %v561_v5 = vpop.f32.mrb[4].mxu0  ;;  %v585_v6 = vpop.f32.mrb[4].mxu1 }
  0xf0   :  { %419 = vst [vmem:[#allocation2 + $0x18] sm:$0xff] %v387_v1  ;;  %435 = vst [vmem:[#allocation2 + $0x98] sm:$0xff] %v403_v2  ;;  %v251_v7 = vadd.f32 %v561_v5, %v830_v44  ;;  %v331_v8 = vadd.f32 %v585_v6, %v830_v44  ;;  %v245_v9 = vpop.f32.mrb[5].mxu0  ;;  %v325_v10 = vpop.f32.mrb[5].mxu1 }
  0xf1   :  { %418 = vst [vmem:[#allocation2 + $0x10] sm:$0xff] %v386_v3  ;;  %434 = vst [vmem:[#allocation2 + $0x90] sm:$0xff] %v402_v4  ;;  %v246_v11 = vadd.f32 %v830_v44, %v245_v9  ;;  %v326_v12 = vadd.f32 %v830_v44, %v325_v10 }
  0xf2   :  { %v389_v13 = vmax.f32 %v251_v7, 0.0  ;;  %v405_v14 = vmax.f32 %v331_v8, 0.0 }
  0xf3   :  { %v388_v15 = vmax.f32 %v246_v11, 0.0  ;;  %v404_v16 = vmax.f32 %v326_v12, 0.0  ;;  %v564_v17 = vpop.f32.mrb[6].mxu0  ;;  %v588_v18 = vpop.f32.mrb[6].mxu1 }
  0xf4   :  { %421 = vst [vmem:[#allocation2 + $0x28] sm:$0xff] %v389_v13  ;;  %437 = vst [vmem:[#allocation2 + $0xa8] sm:$0xff] %v405_v14  ;;  %v261_v19 = vadd.f32 %v564_v17, %v830_v44  ;;  %v341_v20 = vadd.f32 %v588_v18, %v830_v44  ;;  %v255_v21 = vpop.f32.mrb[7].mxu0  ;;  %v335_v22 = vpop.f32.mrb[7].mxu1 }
  0xf5   :  { %420 = vst [vmem:[#allocation2 + $0x20] sm:$0xff] %v388_v15  ;;  %436 = vst [vmem:[#allocation2 + $0xa0] sm:$0xff] %v404_v16  ;;  %v256_v23 = vadd.f32 %v830_v44, %v255_v21  ;;  %v336_v24 = vadd.f32 %v830_v44, %v335_v22 }
  0xf6   :  { %v391_v25 = vmax.f32 %v261_v19, 0.0  ;;  %v407_v26 = vmax.f32 %v341_v20, 0.0 }
  0xf7   :  { %v390_v27 = vmax.f32 %v256_v23, 0.0  ;;  %v406_v28 = vmax.f32 %v336_v24, 0.0  ;;  %v567_v29 = vpop.f32.mrb[8].mxu0  ;;  %v591_v30 = vpop.f32.mrb[8].mxu1 }
  0xf8   :  { %423 = vst [vmem:[#allocation2 + $0x38] sm:$0xff] %v391_v25  ;;  %439 = vst [vmem:[#allocation2 + $0xb8] sm:$0xff] %v407_v26  ;;  %v271_v31 = vadd.f32 %v567_v29, %v830_v44  ;;  %v351_v32 = vadd.f32 %v591_v30, %v830_v44  ;;  %v265_v33 = vpop.f32.mrb[9].mxu0  ;;  %v345_v34 = vpop.f32.mrb[9].mxu1 }
  0xf9   :  { %422 = vst [vmem:[#allocation2 + $0x30] sm:$0xff] %v390_v27  ;;  %438 = vst [vmem:[#allocation2 + $0xb0] sm:$0xff] %v406_v28  ;;  %v266_v35 = vadd.f32 %v830_v44, %v265_v33  ;;  %v346_v36 = vadd.f32 %v830_v44, %v345_v34 }
  0xfa   :  { %v393_v37 = vmax.f32 %v271_v31, 0.0  ;;  %v409_v38 = vmax.f32 %v351_v32, 0.0 }
  0xfb   :  { %v392_v39 = vmax.f32 %v266_v35, 0.0  ;;  %v408_v40 = vmax.f32 %v346_v36, 0.0  ;;  %v570_v41 = vpop.f32.mrb[10].mxu0  ;;  %v594_v42 = vpop.f32.mrb[10].mxu1 }
  0xfc   :  { %425 = vst [vmem:[#allocation2 + $0x48] sm:$0xff] %v393_v37  ;;  %441 = vst [vmem:[#allocation2 + $0xc8] sm:$0xff] %v409_v38  ;;  %v281_v43 = vadd.f32 %v570_v41, %v830_v44  ;;  %v361_v45 = vadd.f32 %v594_v42, %v830_v44  ;;  %v275_v46 = vpop.f32.mrb[11].mxu0  ;;  %v355_v47 = vpop.f32.mrb[11].mxu1 }
  0xfd   :  { %424 = vst [vmem:[#allocation2 + $0x40] sm:$0xff] %v392_v39  ;;  %440 = vst [vmem:[#allocation2 + $0xc0] sm:$0xff] %v408_v40  ;;  %v276_v48 = vadd.f32 %v830_v44, %v275_v46  ;;  %v356_v49 = vadd.f32 %v830_v44, %v355_v47 }
  0xfe   :  { %v395_v50 = vmax.f32 %v281_v43, 0.0  ;;  %v411_v51 = vmax.f32 %v361_v45, 0.0 }
  0xff   :  { %v394_v52 = vmax.f32 %v276_v48, 0.0  ;;  %v410_v53 = vmax.f32 %v356_v49, 0.0  ;;  %v573_v54 = vpop.f32.mrb[12].mxu0  ;;  %v597_v55 = vpop.f32.mrb[12].mxu1 }
 0x100   :  { %427 = vst [vmem:[#allocation2 + $0x58] sm:$0xff] %v395_v50  ;;  %443 = vst [vmem:[#allocation2 + $0xd8] sm:$0xff] %v411_v51  ;;  %v291_v56 = vadd.f32 %v573_v54, %v830_v44  ;;  %v371_v57 = vadd.f32 %v597_v55, %v830_v44  ;;  %v285_v58 = vpop.f32.mrb[13].mxu0  ;;  %v365_v59 = vpop.f32.mrb[13].mxu1 }
 0x101   :  { %426 = vst [vmem:[#allocation2 + $0x50] sm:$0xff] %v394_v52  ;;  %442 = vst [vmem:[#allocation2 + $0xd0] sm:$0xff] %v410_v53  ;;  %v286_v60 = vadd.f32 %v830_v44, %v285_v58  ;;  %v366_v61 = vadd.f32 %v830_v44, %v365_v59 }
 0x102   :  { %v397_v62 = vmax.f32 %v291_v56, 0.0  ;;  %v413_v63 = vmax.f32 %v371_v57, 0.0 }
 0x103   :  { %v396_v0 = vmax.f32 %v286_v60, 0.0  ;;  %v412_v1 = vmax.f32 %v366_v61, 0.0  ;;  %v576_v2 = vpop.f32.mrb[14].mxu0  ;;  %v600_v3 = vpop.f32.mrb[14].mxu1 }
 0x104   :  { %429 = vst [vmem:[#allocation2 + $0x68] sm:$0xff] %v397_v62  ;;  %445 = vst [vmem:[#allocation2 + $0xe8] sm:$0xff] %v413_v63  ;;  %v301_v4 = vadd.f32 %v576_v2, %v830_v44  ;;  %v381_v5 = vadd.f32 %v600_v3, %v830_v44  ;;  %v295_v6 = vpop.f32.mrb[15].mxu0  ;;  %v375_v7 = vpop.f32.mrb[15].mxu1 }
 0x105   :  { %428 = vst [vmem:[#allocation2 + $0x60] sm:$0xff] %v396_v0  ;;  %444 = vst [vmem:[#allocation2 + $0xe0] sm:$0xff] %v412_v1  ;;  %v296_v8 = vadd.f32 %v830_v44, %v295_v6  ;;  %v376_v9 = vadd.f32 %v830_v44, %v375_v7 }
 0x106   :  { %v399_v10 = vmax.f32 %v301_v4, 0.0  ;;  %v415_v11 = vmax.f32 %v381_v5, 0.0 }
 0x107   :  { %v398_v12 = vmax.f32 %v296_v8, 0.0  ;;  %v414_v13 = vmax.f32 %v376_v9, 0.0 }
 0x108   :  { %431 = vst [vmem:[#allocation2 + $0x78] sm:$0xff] %v399_v10  ;;  %447 = vst [vmem:[#allocation2 + $0xf8] sm:$0xff] %v415_v11 }
 0x109   :  { %430 = vst [vmem:[#allocation2 + $0x70] sm:$0xff] %v398_v12  ;;  %446 = vst [vmem:[#allocation2 + $0xf0] sm:$0xff] %v414_v13 }
 0x10a   :  { %639 = shalt.err (!%p636_p4)
}
 0x10b   :  { %s640_s13 = scalar_lea.hbm %s879_s3, 4096 }
 0x10c   :  { %p641_p5 = scmp.ne.s32.totalorder %s879_s3, %s640_s13  ;;  %p644_p6 = scmp.lt.u32.totalorder %s640_s13, %s879_s3 }
 0x10e   :  { %p646_p7 = pnand %p644_p6, %p641_p5 }
 0x110   :  { %649 = shalt.err (!%p646_p7)
}
 0x111   :  { %s653_s18 = smov 128   ;;  %s654_s19 = smov 8  }
 0x112   :  { %459 = dma.vmem_to_hbm [thread:$0]  %s454_s2, 4096, %s879_s3, [#allocation3], %s653_s18, %s653_s18, %s654_s19  }
 0x113   :  { %650 = dma.done.wait [#allocation3], 4096  }
 0x114   :  { %651 = vsyncadd [#allocation3], 4294963200 }
 0x115   :  { %463 = vsyncpa [#allocation3], 1 }

</bundles_post_ra>
